<compile_context>
chip_gen: v6e
topology: v6e:2x2x1
jax: 0.10.0
libtpu: 0.0.40
codegen_flags: <defaults>
</compile_context>

<pallas_src>
import functools
import math

import jax
import jax.numpy as jnp
from jax.experimental import pallas as pl
from jax.experimental.pallas import tpu as pltpu

# int32 two's-complement views of the uint32 hash constants.
_GOLD = -1640531527   # 0x9E3779B9
_MIX1 = 0x7FEB352D    # 2146121773
_MIX2 = -2073298805   # 0x846CA68B


def _srl(x, k):
    """Logical right shift for int32 (arithmetic shift + mask of high bits)."""
    return (x >> k) & jnp.int32((1 << (32 - k)) - 1)


def _lowbias32(x):
    """32-bit integer avalanche finalizer (lowbias32); int32 in/out."""
    x = x ^ _srl(x, 16)
    x = x * jnp.int32(_MIX1)
    x = x ^ _srl(x, 15)
    x = x * jnp.int32(_MIX2)
    x = x ^ _srl(x, 16)
    return x


def _pe_dropout_kernel(seed_ref, x_ref, pe_ref, o_ref, *, p, block_rows):
    """Fused (x + pe) + inverted dropout on one (TS, B, D) tile.

    seed_ref : SMEM scalar-prefetch ref, shape (1,), int32 seed
    x_ref    : VMEM ref, (TS, B, D)
    pe_ref   : VMEM ref, (TS, 1, D)  (broadcast over batch)
    o_ref    : VMEM ref, (TS, B, D)
    """
    y = x_ref[...] + pe_ref[...]  # broadcast over the batch axis

    if p > 0.0:
        ts, b, d = y.shape
        # Global element counter -> randomness is independent of the tiling
        # and every tile gets a distinct stream (row offset = program_id * TS).
        row0 = pl.program_id(0) * block_rows
        s_idx = jax.lax.broadcasted_iota(jnp.int32, y.shape, 0) + row0
        b_idx = jax.lax.broadcasted_iota(jnp.int32, y.shape, 1)
        d_idx = jax.lax.broadcasted_iota(jnp.int32, y.shape, 2)
        lin = (s_idx * b + b_idx) * d + d_idx

        bits = _lowbias32(lin + seed_ref[0] * jnp.int32(_GOLD))

        # Integer-domain keep test on the low 31 (non-negative) bits:
        #   drop with prob p  <=>  r31 < round(p * 2^31)
        r31 = bits & jnp.int32(0x7FFFFFFF)
        thresh = jnp.int32(min(int(round(p * float(1 << 31))), (1 << 31) - 1))
        keep = r31 >= thresh
        scale = jnp.float32(1.0 / (1.0 - p))
        y = jnp.where(keep, y * scale, jnp.float32(0.0))

    o_ref[...] = y.astype(o_ref.dtype)


def make_pe_table(d_model, max_len=5000, dtype=jnp.float32):
    """Replicates PositionalEncoding.__init__'s buffer -> (max_len, 1, d_model)."""
    position = jnp.arange(max_len, dtype=jnp.float32)[:, None]
    div_term = jnp.exp(
        jnp.arange(0, d_model, 2, dtype=jnp.float32) * (-math.log(10000.0) / d_model)
    )
    pe = jnp.zeros((max_len, d_model), dtype=jnp.float32)
    pe = pe.at[:, 0::2].set(jnp.sin(position * div_term))
    pe = pe.at[:, 1::2].set(jnp.cos(position * div_term))
    return pe[:, None, :].astype(dtype)  # (max_len, 1, d_model)


def positional_encoding_forward(x, pe_table, seed, *, p=0.1, training=True,
                                block_bytes=2 * 1024 * 1024):
    """x: (S, B, D).  Returns dropout(x + pe[:S]) (inverted dropout if training)."""
    S, B, D = x.shape
    assert pe_table.ndim == 3 and pe_table.shape[1] == 1 and pe_table.shape[2] == D
    assert pe_table.shape[0] >= S, "sequence longer than max_len of the PE table"

    p_eff = float(p) if training else 0.0
    if not (0.0 <= p_eff < 1.0):
        raise ValueError(f"dropout p must be in [0, 1), got {p_eff}")

    # Tile over the sequence axis.  Keep each x/out block <= ~block_bytes so the
    # double-buffered pipeline (x-in, out, tiny pe) stays well under the default
    # scoped VMEM limit on every generation (16 MiB v5e, 32 MiB v6e/v7x).
    # NOTE: for real workloads D should be a multiple of 128 for lane-dense
    # stores; the toy demo shapes below are just for the smoke test.
    row_bytes = B * D * x.dtype.itemsize
    ts = int(max(1, min(S, block_bytes // max(1, row_bytes))))
    grid = (pl.cdiv(S, ts),)

    kernel = functools.partial(_pe_dropout_kernel, p=p_eff, block_rows=ts)

    grid_spec = pltpu.PrefetchScalarGridSpec(
        num_scalar_prefetch=1,  # seed -> SMEM, passed to every index_map
        grid=grid,
        in_specs=[
            pl.BlockSpec((ts, B, D), lambda i, seed_ref: (i, 0, 0)),
            # pe_table is addressed directly by block index along S; it stays
            # tiny in VMEM and broadcasts over batch inside the kernel.
            pl.BlockSpec((ts, 1, D), lambda i, seed_ref: (i, 0, 0)),
        ],
        out_specs=pl.BlockSpec((ts, B, D), lambda i, seed_ref: (i, 0, 0)),
    )

    return pl.pallas_call(
        kernel,
        out_shape=jax.ShapeDtypeStruct((S, B, D), x.dtype),
        grid_spec=grid_spec,
        compiler_params=pltpu.CompilerParams(
            # Tiles are independent -> shard across the 2 TensorCores on v7x.
            dimension_semantics=("parallel",),
        ),
    )(jnp.asarray([seed], dtype=jnp.int32), x, pe_table)


if __name__ == "__main__":
    key = jax.random.PRNGKey(0)

    # Small shapes consistent with the forward: [seq, batch, d_model]
    S, B, D = 8, 2, 32
    x = jax.random.normal(key, (S, B, D), dtype=jnp.float32)
    pe_table = make_pe_table(d_model=D, max_len=64)

    p = 0.1
    out_train = jax.block_until_ready(
        positional_encoding_forward(x, pe_table, seed=0, p=p, training=True))
    out_eval = jax.block_until_ready(
        positional_encoding_forward(x, pe_table, seed=0, p=p, training=False))

    ref = x + pe_table[:S]

    # Eval mode: dropout is identity.
    assert out_eval.shape == (S, B, D)
    assert jnp.allclose(out_eval, ref, atol=1e-6), "eval-mode mismatch"

    # Training mode: every element is either dropped (0) or scaled by 1/(1-p).
    scaled = ref * (1.0 / (1.0 - p))
    ok = (jnp.isclose(out_train, 0.0, atol=1e-6)
          | jnp.isclose(out_train, scaled, atol=1e-5, rtol=1e-5))
    assert out_train.shape == (S, B, D)
    assert bool(jnp.all(ok)), "training-mode dropout mismatch"

    print("KERNEL_OK")
</pallas_src>

<mosaic_0001>
module attributes {stable_mosaic.version = 11 : i64} {
  func.func @_pe_dropout_kernel(%arg0: i32, %arg1: memref<1xi32, #tpu.memory_space<smem>>, %arg2: memref<8x2x32xf32, #tpu.memory_space<vmem>>, %arg3: memref<8x1x32xf32, #tpu.memory_space<vmem>>, %arg4: memref<8x2x32xf32, #tpu.memory_space<vmem>>) attributes {dimension_semantics = [#tpu.dimension_semantics<parallel>], iteration_bounds = array<i64: 1>, scalar_prefetch = 1 : i64, scratch_operands = 0 : i64, tpu.core_type = #tpu.core_type<tc>, window_params = [{transform_indices = @transform_0, window_bounds = array<i64: 8, 2, 32>}, {transform_indices = @transform_1, window_bounds = array<i64: 8, 1, 32>}, {transform_indices = @transform_2, window_bounds = array<i64: 8, 2, 32>}]} {
    %c0 = arith.constant 0 : index
    %c0_0 = arith.constant 0 : index
    %c0_1 = arith.constant 0 : index
    %0 = vector.load %arg2[%c0, %c0_0, %c0_1] : memref<8x2x32xf32, #tpu.memory_space<vmem>>, vector<8x2x32xf32>
    %c0_2 = arith.constant 0 : index
    %c0_3 = arith.constant 0 : index
    %c0_4 = arith.constant 0 : index
    %1 = vector.load %arg3[%c0_2, %c0_3, %c0_4] : memref<8x1x32xf32, #tpu.memory_space<vmem>>, vector<8x1x32xf32>
    %2 = vector.broadcast %1 : vector<8x1x32xf32> to vector<8x2x32xf32>
    %3 = arith.addf %0, %2 : vector<8x2x32xf32>
    %c8_i32 = arith.constant 8 : i32
    %4 = arith.muli %arg0, %c8_i32 : i32
    %5 = tpu.iota {dimensions = array<i32: 0>} : vector<8x2x32xi32>
    %6 = vector.broadcast %4 : i32 to vector<8x2x32xi32>
    %7 = arith.addi %5, %6 : vector<8x2x32xi32>
    %8 = tpu.iota {dimensions = array<i32: 1>} : vector<8x2x32xi32>
    %9 = tpu.iota {dimensions = array<i32: 2>} : vector<8x2x32xi32>
    %c2_i32 = arith.constant 2 : i32
    %10 = vector.broadcast %c2_i32 : i32 to vector<8x2x32xi32>
    %11 = arith.muli %7, %10 : vector<8x2x32xi32>
    %12 = arith.addi %11, %8 : vector<8x2x32xi32>
    %c32_i32 = arith.constant 32 : i32
    %13 = vector.broadcast %c32_i32 : i32 to vector<8x2x32xi32>
    %14 = arith.muli %12, %13 : vector<8x2x32xi32>
    %15 = arith.addi %14, %9 : vector<8x2x32xi32>
    %c0_5 = arith.constant 0 : index
    %16 = memref.load %arg1[%c0_5] : memref<1xi32, #tpu.memory_space<smem>>
    %c-1640531527_i32 = arith.constant -1640531527 : i32
    %17 = arith.muli %16, %c-1640531527_i32 : i32
    %18 = vector.broadcast %17 : i32 to vector<8x2x32xi32>
    %19 = arith.addi %15, %18 : vector<8x2x32xi32>
    %c16_i32 = arith.constant 16 : i32
    %20 = vector.broadcast %c16_i32 : i32 to vector<8x2x32xi32>
    %21 = arith.shrsi %19, %20 : vector<8x2x32xi32>
    %c65535_i32 = arith.constant 65535 : i32
    %22 = vector.broadcast %c65535_i32 : i32 to vector<8x2x32xi32>
    %23 = arith.andi %21, %22 : vector<8x2x32xi32>
    %24 = arith.xori %19, %23 : vector<8x2x32xi32>
    %c2146121005_i32 = arith.constant 2146121005 : i32
    %25 = vector.broadcast %c2146121005_i32 : i32 to vector<8x2x32xi32>
    %26 = arith.muli %24, %25 : vector<8x2x32xi32>
    %c15_i32 = arith.constant 15 : i32
    %27 = vector.broadcast %c15_i32 : i32 to vector<8x2x32xi32>
    %28 = arith.shrsi %26, %27 : vector<8x2x32xi32>
    %c131071_i32 = arith.constant 131071 : i32
    %29 = vector.broadcast %c131071_i32 : i32 to vector<8x2x32xi32>
    %30 = arith.andi %28, %29 : vector<8x2x32xi32>
    %31 = arith.xori %26, %30 : vector<8x2x32xi32>
    %c-2073298805_i32 = arith.constant -2073298805 : i32
    %32 = vector.broadcast %c-2073298805_i32 : i32 to vector<8x2x32xi32>
    %33 = arith.muli %31, %32 : vector<8x2x32xi32>
    %c16_i32_6 = arith.constant 16 : i32
    %34 = vector.broadcast %c16_i32_6 : i32 to vector<8x2x32xi32>
    %35 = arith.shrsi %33, %34 : vector<8x2x32xi32>
    %c65535_i32_7 = arith.constant 65535 : i32
    %36 = vector.broadcast %c65535_i32_7 : i32 to vector<8x2x32xi32>
    %37 = arith.andi %35, %36 : vector<8x2x32xi32>
    %38 = arith.xori %33, %37 : vector<8x2x32xi32>
    %c2147483647_i32 = arith.constant 2147483647 : i32
    %39 = vector.broadcast %c2147483647_i32 : i32 to vector<8x2x32xi32>
    %40 = arith.andi %38, %39 : vector<8x2x32xi32>
    %c214748365_i32 = arith.constant 214748365 : i32
    %41 = vector.broadcast %c214748365_i32 : i32 to vector<8x2x32xi32>
    %42 = arith.cmpi sge, %40, %41 : vector<8x2x32xi32>
    %cst = arith.constant 1.11111116 : f32
    %43 = vector.broadcast %cst : f32 to vector<8x2x32xf32>
    %44 = arith.mulf %3, %43 : vector<8x2x32xf32>
    %cst_8 = arith.constant 0.000000e+00 : f32
    %45 = vector.broadcast %cst_8 : f32 to vector<8x2x32xf32>
    %46 = arith.select %42, %44, %45 : vector<8x2x32xi1>, vector<8x2x32xf32>
    %c0_9 = arith.constant 0 : index
    %c0_10 = arith.constant 0 : index
    %c0_11 = arith.constant 0 : index
    %47 = vector.load %arg4[%c0_9, %c0_10, %c0_11] : memref<8x2x32xf32, #tpu.memory_space<vmem>>, vector<8x2x32xf32>
    tpu.vector_store %arg4[%c0_9, %c0_10, %c0_11], %46 {strides = array<i32>} : memref<8x2x32xf32, #tpu.memory_space<vmem>>, vector<8x2x32xf32>,
    return
  }
  func.func @transform_0(%arg0: i32, %arg1: memref<1xi32, #tpu.memory_space<smem>>) -> (i32, i32, i32) {
    %c0_i32 = arith.constant 0 : i32
    %c0_i32_0 = arith.constant 0 : i32
    %c0_i32_1 = arith.constant 0 : i32
    return %arg0, %c0_i32, %c0_i32_0 : i32, i32, i32
  }
  func.func @transform_1(%arg0: i32, %arg1: memref<1xi32, #tpu.memory_space<smem>>) -> (i32, i32, i32) {
    %c0_i32 = arith.constant 0 : i32
    %c0_i32_0 = arith.constant 0 : i32
    %c0_i32_1 = arith.constant 0 : i32
    return %arg0, %c0_i32, %c0_i32_0 : i32, i32, i32
  }
  func.func @transform_2(%arg0: i32, %arg1: memref<1xi32, #tpu.memory_space<smem>>) -> (i32, i32, i32) {
    %c0_i32 = arith.constant 0 : i32
    %c0_i32_0 = arith.constant 0 : i32
    %c0_i32_1 = arith.constant 0 : i32
    return %arg0, %c0_i32, %c0_i32_0 : i32, i32, i32
  }
}

</mosaic_0001>

<bundles_post_ra>
// kernel: tpu_custom_call.1
= control target key start
LH: loop header
LB: loop body
LE: loop exit
PB: predicated region body
PF: predicated region fallthrough
CT: control target
= control target key end

     0   :  { %v95_v2 = vlaneseq  ;;  %s477_s0 = inlined_call_operand.<no memory space> [shape: s32[1], index: 0, kind: input, shape index: {}]   ;;  %s478_s1 = inlined_call_operand.vmem [shape: f32[8,2,32], index: 1, kind: input, shape index: {}]   ;;  %s479_s2 = inlined_call_operand.vmem [shape: f32[64,1,32], index: 2, kind: input, shape index: {}]   ;;  %s480_s3 = inlined_call_operand.hbm [shape: f32[8,2,32], index: 3, kind: output, shape index: {}]  }
   0x1   :  { %v14_v0 = vld [vmem:[%s478_s1] sm:$0x3]  ;;  %s132_s18 = smul.u32 2654435769, %s477_s0  ;;  %v15_v3 = vld [vmem:[%s478_s1 + $0x2] sm:$0x3] }
   0x2   :  { %v287_v1 = vld [vmem:[%s479_s2] ss:$0 sm:$0xff]  ;;  %v288_v4 = vld [vmem:[%s479_s2 + $0x1] ss:$0 sm:$0xff]  ;;  %v382_v5 = vshrl.u32 %v95_v2, 7  ;;  %v384_v6 = vand.u32 127, %v95_v2 }
   0x3   :  { %v16_v7 = vld [vmem:[%s478_s1 + $0x4] sm:$0x3]  ;;  %v289_v8 = vld [vmem:[%s479_s2 + $0x2] ss:$0 sm:$0xff]  ;;  %v78_v9 = vadd.f32 %v287_v1, %v14_v0  ;;  %v79_v10 = vadd.f32 %v288_v4, %v15_v3  ;;  %v17_v11 = vld [vmem:[%s478_s1 + $0x6] sm:$0x3]  ;;  %v401_v17 = vstv %s132_s18 }
   0x4   :  { %v290_v12 = vld [vmem:[%s479_s2 + $0x3] ss:$0 sm:$0xff]  ;;  %v115_v13 = vmul.u32 32, %v382_v5  ;;  %v108_v14 = vadd.s32 2, %v382_v5  ;;  %v80_v15 = vadd.f32 %v289_v8, %v16_v7  ;;  %v109_v16 = vadd.s32 4, %v382_v5 }
   0x5   :  { %v81_v18 = vadd.f32 %v290_v12, %v17_v11  ;;  %v110_v19 = vadd.s32 6, %v382_v5  ;;  %v111_v20 = vadd.s32 8, %v382_v5  ;;  %v406_v24 = vmul.f32 1.1111112, %v78_v9  ;;  %v18_v32 = vld [vmem:[%s478_s1 + $0x8] sm:$0x3] }
   0x6   :  { %v123_v21 = vadd.s32 %v115_v13, %v384_v6  ;;  %v116_v22 = vmul.u32 32, %v108_v14  ;;  %v117_v23 = vmul.u32 32, %v109_v16  ;;  %v408_v25 = vmul.f32 1.1111112, %v79_v10  ;;  %v291_v33 = vld [vmem:[%s479_s2 + $0x4] ss:$0 sm:$0xff] }
   0x7   :  { %v118_v26 = vmul.u32 32, %v110_v19  ;;  %v119_v27 = vmul.u32 32, %v111_v20  ;;  %v413_v31 = vmul.f32 1.1111112, %v80_v15  ;;  %v422_v35 = vmul.f32 1.1111112, %v81_v18 }
   0x8   :  { %v134_v28 = vadd.s32 %v401_v17, %v123_v21  ;;  %v124_v29 = vadd.s32 %v116_v22, %v384_v6  ;;  %v125_v30 = vadd.s32 %v117_v23, %v384_v6  ;;  %v19_v37 = vld [vmem:[%s478_s1 + $0xa] sm:$0x3]  ;;  %v112_v38 = vadd.s32 10, %v382_v5  ;;  %v292_v42 = vld [vmem:[%s479_s2 + $0x5] ss:$0 sm:$0xff] }
   0x9   :  { %v126_v34 = vadd.s32 %v118_v26, %v384_v6  ;;  %v127_v36 = vadd.s32 %v119_v27, %v384_v6 }
   0xa   :  { %v295_v39 = vshrl.u32 %v134_v28, 16  ;;  %v135_v40 = vadd.s32 %v401_v17, %v124_v29  ;;  %v136_v41 = vadd.s32 %v401_v17, %v125_v30 }
   0xb   :  { %9 = vsyncpa [#allocation5], 0  ;;  %v137_v43 = vadd.s32 %v401_v17, %v126_v34  ;;  %v82_v44 = vadd.f32 %v291_v33, %v18_v32  ;;  %v138_v45 = vadd.s32 %v401_v17, %v127_v36  ;;  %v120_v46 = vmul.u32 32, %v112_v38  ;;  %s344_s19 = smov [#allocation4]  }
   0xc   :  { %v158_v47 = vxor.u32 %v295_v39, %v134_v28  ;;  %v296_v48 = vshrl.u32 %v135_v40, 16  ;;  %v297_v49 = vshrl.u32 %v136_v41, 16  ;;  %v113_v50 = vadd.s32 12, %v382_v5  ;;  %s276_s20 = sshll.u32 %s344_s19, 4  ;;  %s277_s20 = int_to_ptr.vmem [resolvable:$true] %s276_s20 }
   0xd   :  { %v298_v51 = vshrl.u32 %v137_v43, 16  ;;  %v299_v52 = vshrl.u32 %v138_v45, 16  ;;  %v437_v53 = vadd.f32 %v292_v42, %v19_v37  ;;  %v128_v54 = vadd.s32 %v120_v46, %v384_v6  ;;  %p327_p1 = scmp.lt.s32.totalorder %s277_s20, %s277_s20 }
   0xe   :  { %v166_v55 = vmul.u32 2146121005, %v158_v47  ;;  %v159_v56 = vxor.u32 %v296_v48, %v135_v40  ;;  %v160_v57 = vxor.u32 %v297_v49, %v136_v41  ;;  %v121_v58 = vmul.u32 32, %v113_v50 }
   0xf   :  { %v161_v59 = vxor.u32 %v298_v51, %v137_v43  ;;  %v162_v60 = vxor.u32 %v299_v52, %v138_v45  ;;  %v440_v61 = vmul.f32 1.1111112, %v82_v44  ;;  %v139_v62 = vadd.s32 %v401_v17, %v128_v54  ;;  %v20_v51 = vld [vmem:[%s478_s1 + $0xc] sm:$0x3] }
  0x10   :  { %v303_v63 = vshrl.u32 %v166_v55, 15  ;;  %v167_v0 = vmul.u32 2146121005, %v159_v56  ;;  %v168_v1 = vmul.u32 2146121005, %v160_v57  ;;  %v129_v2 = vadd.s32 %v121_v58, %v384_v6 }
  0x11   :  { %v169_v3 = vmul.u32 2146121005, %v161_v59  ;;  %v170_v4 = vmul.u32 2146121005, %v162_v60  ;;  %v300_v7 = vshrl.u32 %v139_v62, 16  ;;  %v114_v8 = vadd.s32 14, %v382_v5 }
  0x12   :  { %v190_v9 = vxor.u32 %v303_v63, %v166_v55  ;;  %v304_v10 = vshrl.u32 %v167_v0, 15  ;;  %v305_v11 = vshrl.u32 %v168_v1, 15  ;;  %v140_v12 = vadd.s32 %v401_v17, %v129_v2 }
  0x13   :  { %vm262_vm0 = vcmask 254976   ;;  %v306_v13 = vshrl.u32 %v169_v3, 15  ;;  %v307_v14 = vshrl.u32 %v170_v4, 15  ;;  %v163_v15 = vxor.u32 %v300_v7, %v139_v62 }
  0x14   :  { %v122_v16 = vmul.u32 32, %v114_v8  ;;  %v198_v18 = vmul.u32 2221668491, %v190_v9  ;;  %v191_v19 = vxor.u32 %v304_v10, %v167_v0  ;;  %v192_v20 = vxor.u32 %v305_v11, %v168_v1 }
  0x15   :  { %v301_v21 = vshrl.u32 %v140_v12, 16  ;;  %v193_v22 = vxor.u32 %v306_v13, %v169_v3  ;;  %v194_v23 = vxor.u32 %v307_v14, %v170_v4  ;;  %v171_v26 = vmul.u32 2146121005, %v163_v15 }
  0x16   :  { %v130_v27 = vadd.s32 %v122_v16, %v384_v6  ;;  %v311_v5 = vshrl.u32 %v198_v18, 16  ;;  %v199_v28 = vmul.u32 2221668491, %v191_v19  ;;  %v200_v29 = vmul.u32 2221668491, %v192_v20 }
  0x17   :  { %v164_v30 = vxor.u32 %v301_v21, %v140_v12  ;;  %v201_v32 = vmul.u32 2221668491, %v193_v22  ;;  %v202_v33 = vmul.u32 2221668491, %v194_v23  ;;  %v308_v34 = vshrl.u32 %v171_v26, 15 }
  0x18   :  { %v141_v36 = vadd.s32 %v401_v17, %v130_v27  ;;  %v222_v37 = vxor.u32 %v311_v5, %v198_v18  ;;  %v312_v38 = vshrl.u32 %v199_v28, 16  ;;  %v313_v39 = vshrl.u32 %v200_v29, 16  ;;  %v293_v17 = vld [vmem:[%s479_s2 + $0x6] ss:$0 sm:$0xff] }
  0x19   :  { %v172_v40 = vmul.u32 2146121005, %v164_v30  ;;  %v314_v41 = vshrl.u32 %v201_v32, 16  ;;  %v315_v42 = vshrl.u32 %v202_v33, 16  ;;  %v195_v43 = vxor.u32 %v308_v34, %v171_v26 }
  0x1a   :  { %v302_v44 = vshrl.u32 %v141_v36, 16  ;;  %v230_v45 = vand.u32 2147483647, %v222_v37  ;;  %v223_v46 = vxor.u32 %v312_v38, %v199_v28  ;;  %v224_v6 = vxor.u32 %v313_v39, %v200_v29 }
  0x1b   :  { %v309_v47 = vshrl.u32 %v172_v40, 15  ;;  %v225_v48 = vxor.u32 %v314_v41, %v201_v32  ;;  %v226_v49 = vxor.u32 %v315_v42, %v202_v33  ;;  %v203_v50 = vmul.u32 2221668491, %v195_v43 }
  0x1c   :  { %v165_v52 = vxor.u32 %v302_v44, %v141_v36  ;;  %vm238_vm1 = vcmp.ge.s32.totalorder %v230_v45, 214748365  ;;  %v231_v54 = vand.u32 2147483647, %v223_v46  ;;  %v232_v55 = vand.u32 2147483647, %v224_v6 }
  0x1d   :  { %v196_v56 = vxor.u32 %v309_v47, %v172_v40  ;;  %v254_v57 = vsel %vm238_vm1, %v406_v24, 0.0  ;;  %v233_v58 = vand.u32 2147483647, %v225_v48  ;;  %v234_v59 = vand.u32 2147483647, %v226_v49 }
  0x1e   :  { %v316_v60 = vshrl.u32 %v203_v50, 16  ;;  %263 = vst.msk [vmem:[#allocation4] sm:$0x3] %vm262_vm0, %v254_v57  ;;  %vm239_vm2 = vcmp.ge.s32.totalorder %v231_v54, 214748365  ;;  %v84_v62 = vadd.f32 %v293_v17, %v20_v51 }
  0x1f   :  { %vm240_vm3 = vcmp.ge.s32.totalorder %v232_v55, 214748365  ;;  %v204_v63 = vmul.u32 2221668491, %v196_v56  ;;  %v255_v0 = vsel %vm239_vm2, %v408_v25, 0.0 }
  0x20   :  { %v256_v1 = vsel %vm240_vm3, %v413_v31, 0.0  ;;  %vm241_vm4 = vcmp.ge.s32.totalorder %v233_v58, 214748365  ;;  %vm242_vm5 = vcmp.ge.s32.totalorder %v234_v59, 214748365  ;;  %v227_v3 = vxor.u32 %v316_v60, %v203_v50 }
  0x21   :  { %264 = vst.msk [vmem:[#allocation4 + $0x2] sm:$0x3] %vm262_vm0, %v255_v0  ;;  %265 = vst.msk [vmem:[#allocation4 + $0x4] sm:$0x3] %vm262_vm0, %v256_v1  ;;  %v257_v24 = vsel %vm241_vm4, %v422_v35, 0.0  ;;  %v258_v2 = vsel %vm242_vm5, %v440_v61, 0.0 }
  0x22   :  { %v317_v4 = vshrl.u32 %v204_v63, 16  ;;  %266 = vst.msk [vmem:[#allocation4 + $0x6] sm:$0x3] %vm262_vm0, %v257_v24  ;;  %267 = vst.msk [vmem:[#allocation4 + $0x8] sm:$0x3] %vm262_vm0, %v258_v2 }
  0x23   :  { %v251_v25 = vmul.f32 1.1111112, %v437_v53  ;;  %v173_v7 = vmul.u32 2146121005, %v165_v52  ;;  %v235_v31 = vand.u32 2147483647, %v227_v3 }
  0x24   :  { %v228_v8 = vxor.u32 %v317_v4, %v204_v63  ;;  %v252_v9 = vmul.f32 1.1111112, %v84_v62  ;;  %v21_v35 = vld [vmem:[%s478_s1 + $0xe] sm:$0x3]  ;;  %v294_v61 = vld [vmem:[%s479_s2 + $0x7] ss:$0 sm:$0xff] }
  0x25   :  { %v310_v10 = vshrl.u32 %v173_v7, 15  ;;  %vm243_vm6 = vcmp.ge.s32.totalorder %v235_v31, 214748365  ;;  %v85_v15 = vadd.f32 %v294_v61, %v21_v35  ;;  %s322_s1 = scalar_lea.vmem %s277_s20, 256 }
  0x26   :  { %v236_v11 = vand.u32 2147483647, %v228_v8  ;;  %v259_v12 = vsel %vm243_vm6, %v251_v25, 0.0  ;;  %p323_p0 = scmp.ne.s32.totalorder %s277_s20, %s322_s1  ;;  %p328_p2 = scmp.lt.s32.totalorder %s322_s1, %s322_s1 }
  0x27   :  { %v197_v13 = vxor.u32 %v310_v10, %v173_v7  ;;  %268 = vst.msk [vmem:[#allocation4 + $0xa] sm:$0x3] %vm262_vm0, %v259_v12  ;;  %v253_v19 = vmul.f32 1.1111112, %v85_v15 }
  0x28   :  { %vm244_vm7 = vcmp.ge.s32.totalorder %v236_v11, 214748365  ;;  %p329_p3 = por %p328_p2, %p327_p1 }
  0x29   :  { %v260_v53 = vsel %vm244_vm7, %v252_v9, 0.0  ;;  %v205_v14 = vmul.u32 2221668491, %v197_v13 }
  0x2a   :  { %269 = vst.msk [vmem:[#allocation4 + $0xc] sm:$0x3] %vm262_vm0, %v260_v53  ;;  %p330_p4 = pnand %p329_p3, %p323_p0 }
  0x2b   :  { %v318_v16 = vshrl.u32 %v205_v14, 16 }
  0x2d   :  { %v229_v18 = vxor.u32 %v318_v16, %v205_v14 }
  0x2f   :  { %v237_v20 = vand.u32 2147483647, %v229_v18 }
  0x31   :  { %vm245_vm8 = vcmp.ge.s32.totalorder %v237_v20, 214748365 }
  0x32   :  { %v261_v21 = vsel %vm245_vm8, %v253_v19, 0.0 }
  0x33   :  { %270 = vst.msk [vmem:[#allocation4 + $0xe] sm:$0x3] %vm262_vm0, %v261_v21 }
  0x34   :  { %333 = shalt.err (!%p330_p4)
}
  0x35   :  { %s345_s2 = smov 32   ;;  %s346_s21 = smov 2  }
  0x36   :  { %282 = dma.vmem_to_hbm [thread:$0]  %s277_s20, 256, %s480_s3, [#allocation5], %s345_s2, %s345_s2, %s346_s21  }
  0x37   :  { %342 = dma.done.wait [#allocation5], 256  }
  0x38   :  { %343 = vsyncadd [#allocation5], 4294967040 }
  0x39   :  { %286 = vsyncpa [#allocation5], 1 }

</bundles_post_ra>
